<compile_context>
chip_gen: v6e
topology: v6e:2x2x1
jax: 0.10.0
libtpu: 0.0.40
codegen_flags: <defaults>
</compile_context>

<pallas_src>
import jax
import jax.numpy as jnp
from jax.experimental import pallas as pl
from jax.experimental.pallas import tpu as pltpu

_LANE = 128  # vreg lane width


def _round_up(x, m):
    return (x + m - 1) // m * m


def _sublane_min(*dtypes):
    # f32 -> 8 sublanes, bf16 -> 16, int8/fp8 -> 32 (sub-32-bit packs sublanes).
    return max(8 * (4 // jnp.dtype(dt).itemsize) for dt in dtypes)


def _pad2d(x, rows, cols):
    if x.shape == (rows, cols):
        return x
    return jnp.zeros((rows, cols), x.dtype).at[: x.shape[0], : x.shape[1]].set(x)


def _attention_kernel(h_ref, c_ref, wh_ref, wc_ref, b_ref, v_ref, ctx_ref, aw_ref):
    h = h_ref[...]                                   # (TB, Hp), native dtype
    c = c_ref[...]                                   # (TB, Cp), native dtype
    wdt = wh_ref.dtype

    # energy = tanh([hidden | combined] @ W_attn^T + b) as two MXU dots sharing
    # one f32 accumulation (no concat materialization; combined read once).
    energy = jnp.tanh(
        jnp.dot(h.astype(wdt), wh_ref[...], preferred_element_type=jnp.float32)
        + jnp.dot(c.astype(wdt), wc_ref[...], preferred_element_type=jnp.float32)
        + b_ref[...]
    )                                                # (TB, Hp) f32

    # v-projection: VPU multiply + XLU lane reduce instead of an N=1 MXU matmul.
    # Padded lanes of w/b/v are zero by construction (pack_params invariant),
    # so they contribute nothing to the scores.
    scores = jnp.sum(energy * v_ref[...], axis=-1, keepdims=True)   # (TB, 1)

    # F.softmax over dim=1 of a (B,1) tensor is identically 1.0 for finite
    # scores; exp(s - s) keeps NaN propagation with no max/sum/div. energy is
    # tanh-bounded and v finite, so +/-Inf scores cannot occur.
    aw = jnp.exp(scores - scores)                                    # (TB, 1)

    aw_ref[...] = aw.astype(aw_ref.dtype)
    ctx_ref[...] = (aw * c).astype(ctx_ref.dtype)


def pack_params(w_attn, b_attn, w_v, *, weight_dtype=jnp.bfloat16):
    """One-time parameter packing (hoisted out of the per-call path).

    w_attn : (H, 3H)  PyTorch nn.Linear weight (out_features, in_features)
    b_attn : (H,)
    w_v    : (1, H)
    Returns (w_h, w_c, b, v); padded rows/lanes are ZERO (kernel relies on it):
      w_h : (Hp, Hp) weight_dtype  -- rows of W_attn^T matching `hidden`
      w_c : (Cp, Hp) weight_dtype  -- rows of W_attn^T matching `combined_feat`
      b   : (1, Hp)  f32
      v   : (1, Hp)  f32
    """
    H, K = w_attn.shape
    C = K - H                                        # 2*H
    Hp = _round_up(H, _LANE)
    Cp = _round_up(C, _LANE)
    wT = w_attn.T.astype(weight_dtype)               # (3H, H)
    w_h = jnp.zeros((Hp, Hp), weight_dtype).at[:H, :H].set(wT[:H])
    w_c = jnp.zeros((Cp, Hp), weight_dtype).at[:C, :H].set(wT[H:])
    b = jnp.zeros((1, Hp), jnp.float32).at[0, :H].set(b_attn.astype(jnp.float32))
    v = jnp.zeros((1, Hp), jnp.float32).at[0, :H].set(w_v[0].astype(jnp.float32))
    return w_h, w_c, b, v


def attention_forward(hidden, combined_feat, w_h, w_c, b, v):
    """Replicates Attention.forward with packed params from pack_params.

    hidden        : (B, H) or (1, B, H) or (H,)
    combined_feat : (B, 2*H)
    Returns (context (B, 2H), attention_weights (B, 1)).
    """
    # squeeze / unsqueeze glue from the PyTorch forward. torch's .squeeze(0) is
    # a silent no-op when the leading dim != 1, so guard on the size.
    if hidden.ndim > 2 and hidden.shape[0] == 1:
        hidden = jnp.squeeze(hidden, axis=0)
    if hidden.ndim == 1:
        hidden = hidden[None, :]

    B, H = hidden.shape
    C = combined_feat.shape[1]                       # 2*H
    Hp = w_h.shape[1]
    Cp = w_c.shape[0]

    # Row tile: dtype-specific sublane minimum, grown up to 512 rows to
    # amortize per-grid-step overhead, shrunk if VMEM would overflow.
    sub = _sublane_min(hidden.dtype, combined_feat.dtype)
    TB = min(512, _round_up(B, sub))

    w_bytes = jnp.dtype(w_h.dtype).itemsize
    h_bytes = jnp.dtype(hidden.dtype).itemsize
    c_bytes = jnp.dtype(combined_feat.dtype).itemsize

    def vmem_needed(tb):
        weights = (Hp * Hp + Cp * Hp) * w_bytes + 2 * Hp * 4   # single-buffered
        acts = 2 * tb * (Hp * h_bytes + Cp * c_bytes)          # double-buffered in
        outs = 2 * tb * (Cp * c_bytes + _LANE * 4)             # double-buffered out
        return weights + acts + outs

    _VMEM_CAP = 48 * 1024 * 1024                     # safe under v7x's 64 MiB VMEM
    while TB > sub and vmem_needed(TB) > _VMEM_CAP:
        TB = max(sub, _round_up(TB // 2, sub))
    Bp = _round_up(B, TB)

    h_p = _pad2d(hidden, Bp, Hp)
    c_p = _pad2d(combined_feat, Bp, Cp)

    grid = (Bp // TB,)
    vmem_limit = min(100 * 1024 * 1024, int(vmem_needed(TB) * 1.5) + (4 << 20))

    ctx_p, aw_p = pl.pallas_call(
        _attention_kernel,
        out_shape=(
            jax.ShapeDtypeStruct((Bp, Cp), combined_feat.dtype),  # context (padded)
            jax.ShapeDtypeStruct((Bp, 1), jnp.float32),           # attention weights
        ),
        grid=grid,
        in_specs=[
            pl.BlockSpec((TB, Hp), lambda i: (i, 0)),             # hidden
            pl.BlockSpec((TB, Cp), lambda i: (i, 0)),             # combined_feat
            pl.BlockSpec((Hp, Hp), lambda i: (0, 0),
                         pipeline_mode=pl.Buffered(1)),           # w_h (grid-invariant)
            pl.BlockSpec((Cp, Hp), lambda i: (0, 0),
                         pipeline_mode=pl.Buffered(1)),           # w_c (grid-invariant)
            pl.BlockSpec((1, Hp), lambda i: (0, 0),
                         pipeline_mode=pl.Buffered(1)),           # bias
            pl.BlockSpec((1, Hp), lambda i: (0, 0),
                         pipeline_mode=pl.Buffered(1)),           # v
        ],
        out_specs=(
            pl.BlockSpec((TB, Cp), lambda i: (i, 0)),
            pl.BlockSpec((TB, 1), lambda i: (i, 0)),
        ),
        compiler_params=pltpu.CompilerParams(
            dimension_semantics=("parallel",),
            vmem_limit_bytes=vmem_limit,
        ),
    )(h_p, c_p, w_h, w_c, b, v)

    return ctx_p[:B, :C], aw_p[:B, :]


def init_params(key, hidden_dim):
    """Deterministic PyTorch-Linear-style init: U(-1/sqrt(fan_in), 1/sqrt(fan_in))."""
    k1, k2, k3 = jax.random.split(key, 3)
    fan_attn = 3 * hidden_dim
    bound_attn = 1.0 / jnp.sqrt(fan_attn)
    w_attn = jax.random.uniform(k1, (hidden_dim, 3 * hidden_dim),
                                minval=-bound_attn, maxval=bound_attn,
                                dtype=jnp.float32)
    b_attn = jax.random.uniform(k2, (hidden_dim,),
                                minval=-bound_attn, maxval=bound_attn,
                                dtype=jnp.float32)
    bound_v = 1.0 / jnp.sqrt(hidden_dim)
    w_v = jax.random.uniform(k3, (1, hidden_dim),
                             minval=-bound_v, maxval=bound_v,
                             dtype=jnp.float32)
    return w_attn, b_attn, w_v


if __name__ == "__main__":
    key = jax.random.PRNGKey(0)
    hidden_dim = 32
    B = 2

    k_params, k_h, k_c = jax.random.split(key, 3)
    w_attn, b_attn, w_v = init_params(k_params, hidden_dim)

    # One-time packing (transpose + split + pad + bf16 cast), outside the call path.
    w_h, w_c, b_p, v_p = pack_params(w_attn, b_attn, w_v)

    # hidden comes in as (1, B, H) to exercise the squeeze(0) branch
    hidden = jax.random.normal(k_h, (1, B, hidden_dim), dtype=jnp.float32)
    combined_feat = jax.random.normal(k_c, (B, 2 * hidden_dim), dtype=jnp.float32)

    fwd = jax.jit(attention_forward)
    context, attention_weights = fwd(hidden, combined_feat, w_h, w_c, b_p, v_p)
    jax.block_until_ready((context, attention_weights))

    # Pure-JAX reference check (same math as the PyTorch forward, f32 params).
    h2 = jnp.squeeze(hidden, axis=0)
    energy_ref = jnp.tanh(jnp.concatenate([h2, combined_feat], axis=1) @ w_attn.T
                          + b_attn)
    scores_ref = energy_ref @ w_v.T
    aw_ref = jax.nn.softmax(scores_ref, axis=1)
    ctx_ref = aw_ref * combined_feat

    assert context.shape == (B, 2 * hidden_dim)
    assert attention_weights.shape == (B, 1)
    assert jnp.allclose(context, ctx_ref, atol=1e-5, rtol=1e-5)
    assert jnp.allclose(attention_weights, aw_ref, atol=1e-6, rtol=1e-6)

    print("KERNEL_OK")
</pallas_src>

<mosaic_0001>
module attributes {stable_mosaic.version = 11 : i64} {
  func.func @_attention_kernel(%arg0: i32, %arg1: memref<8x128xf32, #tpu.memory_space<vmem>>, %arg2: memref<8x128xf32, #tpu.memory_space<vmem>>, %arg3: memref<128x128xbf16, #tpu.memory_space<vmem>>, %arg4: memref<128x128xbf16, #tpu.memory_space<vmem>>, %arg5: memref<1x128xf32, #tpu.memory_space<vmem>>, %arg6: memref<1x128xf32, #tpu.memory_space<vmem>>, %arg7: memref<8x128xf32, #tpu.memory_space<vmem>>, %arg8: memref<8x1xf32, #tpu.memory_space<vmem>>) attributes {dimension_semantics = [#tpu.dimension_semantics<parallel>], iteration_bounds = array<i64: 1>, scalar_prefetch = 0 : i64, scratch_operands = 0 : i64, tpu.core_type = #tpu.core_type<tc>, window_params = [{transform_indices = @transform_0, window_bounds = array<i64: 8, 128>}, {transform_indices = @transform_1, window_bounds = array<i64: 8, 128>}, {pipeline_mode = #tpu.pipeline_mode<synchronous>, transform_indices = @transform_2, window_bounds = array<i64: 128, 128>}, {pipeline_mode = #tpu.pipeline_mode<synchronous>, transform_indices = @transform_3, window_bounds = array<i64: 128, 128>}, {pipeline_mode = #tpu.pipeline_mode<synchronous>, transform_indices = @transform_4, window_bounds = array<i64: 1, 128>}, {pipeline_mode = #tpu.pipeline_mode<synchronous>, transform_indices = @transform_5, window_bounds = array<i64: 1, 128>}, {transform_indices = @transform_6, window_bounds = array<i64: 8, 128>}, {transform_indices = @transform_7, window_bounds = array<i64: 8, 1>}]} {
    %c0 = arith.constant 0 : index
    %c0_0 = arith.constant 0 : index
    %0 = vector.load %arg1[%c0, %c0_0] : memref<8x128xf32, #tpu.memory_space<vmem>>, vector<8x128xf32>
    %c0_1 = arith.constant 0 : index
    %c0_2 = arith.constant 0 : index
    %1 = vector.load %arg2[%c0_1, %c0_2] : memref<8x128xf32, #tpu.memory_space<vmem>>, vector<8x128xf32>
    %2 = arith.truncf %0 : vector<8x128xf32> to vector<8x128xbf16>
    %c0_3 = arith.constant 0 : index
    %c0_4 = arith.constant 0 : index
    %3 = vector.load %arg3[%c0_3, %c0_4] : memref<128x128xbf16, #tpu.memory_space<vmem>>, vector<128x128xbf16>
    %cst = arith.constant dense<0.000000e+00> : vector<8x128xf32>
    %4 = tpu.matmul %2, %3, %cst {dimension_numbers = #tpu.dot_dimension_numbers<[1], [0], [0], [1], [0, 0, 1, 1], [], []>} : vector<8x128xbf16>, vector<128x128xbf16>, vector<8x128xf32> -> vector<8x128xf32>
    %5 = arith.truncf %1 : vector<8x128xf32> to vector<8x128xbf16>
    %c0_5 = arith.constant 0 : index
    %c0_6 = arith.constant 0 : index
    %6 = vector.load %arg4[%c0_5, %c0_6] : memref<128x128xbf16, #tpu.memory_space<vmem>>, vector<128x128xbf16>
    %cst_7 = arith.constant dense<0.000000e+00> : vector<8x128xf32>
    %7 = tpu.matmul %5, %6, %cst_7 {dimension_numbers = #tpu.dot_dimension_numbers<[1], [0], [0], [1], [0, 0, 1, 1], [], []>} : vector<8x128xbf16>, vector<128x128xbf16>, vector<8x128xf32> -> vector<8x128xf32>
    %8 = arith.addf %4, %7 : vector<8x128xf32>
    %c0_8 = arith.constant 0 : index
    %c0_9 = arith.constant 0 : index
    %9 = vector.load %arg5[%c0_8, %c0_9] : memref<1x128xf32, #tpu.memory_space<vmem>>, vector<1x128xf32>
    %10 = vector.broadcast %9 : vector<1x128xf32> to vector<8x128xf32>
    %11 = arith.addf %8, %10 : vector<8x128xf32>
    %12 = math.tanh %11 : vector<8x128xf32>
    %c0_10 = arith.constant 0 : index
    %c0_11 = arith.constant 0 : index
    %13 = vector.load %arg6[%c0_10, %c0_11] : memref<1x128xf32, #tpu.memory_space<vmem>>, vector<1x128xf32>
    %14 = vector.broadcast %13 : vector<1x128xf32> to vector<8x128xf32>
    %15 = arith.mulf %12, %14 : vector<8x128xf32>
    %cst_12 = arith.constant dense<0.000000e+00> : vector<8xf32>
    %16 = vector.multi_reduction <add>, %15, %cst_12 [1] : vector<8x128xf32> to vector<8xf32>
    %17 = vector.shape_cast %16 : vector<8xf32> to vector<8x1xf32>
    %18 = arith.subf %17, %17 : vector<8x1xf32>
    %19 = math.exp %18 : vector<8x1xf32>
    %c0_13 = arith.constant 0 : index
    %c0_14 = arith.constant 0 : index
    %20 = vector.load %arg8[%c0_13, %c0_14] : memref<8x1xf32, #tpu.memory_space<vmem>>, vector<8x1xf32>
    tpu.vector_store %arg8[%c0_13, %c0_14], %19 {strides = array<i32>} : memref<8x1xf32, #tpu.memory_space<vmem>>, vector<8x1xf32>,
    %21 = vector.broadcast %19 : vector<8x1xf32> to vector<8x128xf32>
    %22 = arith.mulf %21, %1 : vector<8x128xf32>
    %c0_15 = arith.constant 0 : index
    %c0_16 = arith.constant 0 : index
    %23 = vector.load %arg7[%c0_15, %c0_16] : memref<8x128xf32, #tpu.memory_space<vmem>>, vector<8x128xf32>
    tpu.vector_store %arg7[%c0_15, %c0_16], %22 {strides = array<i32>} : memref<8x128xf32, #tpu.memory_space<vmem>>, vector<8x128xf32>,
    return
  }
  func.func @transform_0(%arg0: i32) -> (i32, i32) {
    %c0_i32 = arith.constant 0 : i32
    %c0_i32_0 = arith.constant 0 : i32
    return %arg0, %c0_i32 : i32, i32
  }
  func.func @transform_1(%arg0: i32) -> (i32, i32) {
    %c0_i32 = arith.constant 0 : i32
    %c0_i32_0 = arith.constant 0 : i32
    return %arg0, %c0_i32 : i32, i32
  }
  func.func @transform_2(%arg0: i32) -> (i32, i32) {
    %c0_i32 = arith.constant 0 : i32
    %c0_i32_0 = arith.constant 0 : i32
    %c0_i32_1 = arith.constant 0 : i32
    return %c0_i32, %c0_i32_0 : i32, i32
  }
  func.func @transform_3(%arg0: i32) -> (i32, i32) {
    %c0_i32 = arith.constant 0 : i32
    %c0_i32_0 = arith.constant 0 : i32
    %c0_i32_1 = arith.constant 0 : i32
    return %c0_i32, %c0_i32_0 : i32, i32
  }
  func.func @transform_4(%arg0: i32) -> (i32, i32) {
    %c0_i32 = arith.constant 0 : i32
    %c0_i32_0 = arith.constant 0 : i32
    %c0_i32_1 = arith.constant 0 : i32
    return %c0_i32, %c0_i32_0 : i32, i32
  }
  func.func @transform_5(%arg0: i32) -> (i32, i32) {
    %c0_i32 = arith.constant 0 : i32
    %c0_i32_0 = arith.constant 0 : i32
    %c0_i32_1 = arith.constant 0 : i32
    return %c0_i32, %c0_i32_0 : i32, i32
  }
  func.func @transform_6(%arg0: i32) -> (i32, i32) {
    %c0_i32 = arith.constant 0 : i32
    %c0_i32_0 = arith.constant 0 : i32
    return %arg0, %c0_i32 : i32, i32
  }
  func.func @transform_7(%arg0: i32) -> (i32, i32) {
    %c0_i32 = arith.constant 0 : i32
    %c0_i32_0 = arith.constant 0 : i32
    return %arg0, %c0_i32 : i32, i32
  }
}

</mosaic_0001>

<bundles_post_ra>
// kernel: attention_forward.1
= control target key start
LH: loop header
LB: loop body
LE: loop exit
PB: predicated region body
PF: predicated region fallthrough
CT: control target
= control target key end

     0   :  { %13 = vsyncpa [#allocation3], 0  ;;  %s518_s0 = inlined_call_operand.vmem [shape: f32[8,128], index: 0, kind: input, shape index: {}]   ;;  %s519_s1 = inlined_call_operand.vmem [shape: f32[8,128], index: 1, kind: input, shape index: {}]   ;;  %s520_s2 = inlined_call_operand.hbm [shape: bf16[128,128], index: 2, kind: input, shape index: {}]   ;;  %s521_s3 = inlined_call_operand.hbm [shape: bf16[128,128], index: 3, kind: input, shape index: {}]   ;;  %s522_s4 = inlined_call_operand.vmem [shape: f32[1,128], index: 4, kind: input, shape index: {}]   ;;  %s523_s5 = inlined_call_operand.vmem [shape: f32[1,128], index: 5, kind: input, shape index: {}]   ;;  %s524_s6 = inlined_call_operand.vmem [shape: f32[8,128], index: 6, kind: output, shape index: {0}]   ;;  %s525_s7 = inlined_call_operand.vmem [shape: f32[8,1], index: 7, kind: output, shape index: {1}]  }
   0x1   :  { %14 = vsyncpa [#allocation5], 0  ;;  %s448_s24 = smov [#allocation2]  }
   0x2   :  { %s24_s25 = sshll.u32 %s448_s24, 4  ;;  %s25_s25 = int_to_ptr.vmem [resolvable:$true] %s24_s25 }
   0x3   :  { %s412_s26 = scalar_lea.vmem %s25_s25, 1024  ;;  %p417_p1 = scmp.lt.s32.totalorder %s25_s25, %s25_s25 }
   0x4   :  { %p413_p0 = scmp.ne.s32.totalorder %s25_s25, %s412_s26  ;;  %p418_p2 = scmp.lt.s32.totalorder %s412_s26, %s412_s26 }
   0x6   :  { %p419_p3 = por %p418_p2, %p417_p1 }
   0x8   :  { %p420_p4 = pnand %p419_p3, %p413_p0 }
   0xa   :  { %423 = shalt.err (!%p420_p4)
}
   0xb   :  { %s449_s27 = smov 64   ;;  %s450_s28 = smov 4  }
   0xc   :  { %30 = dma.hbm_to_vmem [thread:$0]  %s520_s2, 1024, %s25_s25, [#allocation3], %s449_s27, %s449_s27, %s450_s28  }
   0xd   :  { %s451_s8 = smov [#allocation4]  }
   0xe   :  { %s36_s9 = sshll.u32 %s451_s8, 4  ;;  %s37_s9 = int_to_ptr.vmem [resolvable:$true] %s36_s9 }
   0xf   :  { %s432_s10 = scalar_lea.vmem %s37_s9, 1024  ;;  %p437_p6 = scmp.lt.s32.totalorder %s37_s9, %s37_s9 }
  0x10   :  { %p433_p5 = scmp.ne.s32.totalorder %s37_s9, %s432_s10  ;;  %p438_p7 = scmp.lt.s32.totalorder %s432_s10, %s432_s10 }
  0x12   :  { %p439_p8 = por %p438_p7, %p437_p6 }
  0x14   :  { %p440_p9 = pnand %p439_p8, %p433_p5 }
  0x16   :  { %443 = shalt.err (!%p440_p9)
}
  0x17   :  { %42 = dma.hbm_to_vmem [thread:$0]  %s521_s3, 1024, %s37_s9, [#allocation5], %s449_s27, %s449_s27, %s450_s28  }
  0x18   :  { %444 = dma.done.wait [#allocation3], 1024  }
  0x19   :  { %445 = vsyncadd [#allocation3], 4294966272 }
  0x1a   :  { %446 = dma.done.wait [#allocation5], 1024  }
  0x1b   :  { %447 = vsyncadd [#allocation5], 4294966272  ;;  %v452_v0 = vmov 0.0   ;;  %vm453_vm0 = vmmov 0   ;;  %v384_v1 = vld [vmem:[#allocation4 + $0x38] sm:$0xff]   ;;  %v386_v3 = vld [vmem:[#allocation4 + $0x30] sm:$0xff]  }
  0x1c   :  { %338 = vmatprep.subr.bf16.mxu0 %v452_v0  ;;  %358 = vmatprep.subr.bf16.mxu1 %v452_v0  ;;  %v385_v2 = vld [vmem:[#allocation2 + $0x38] sm:$0xff]   ;;  %v387_v4 = vld [vmem:[#allocation2 + $0x30] sm:$0xff]   ;;  %v388_v5 = vld [vmem:[#allocation4 + $0x28] sm:$0xff]   ;;  %vm288_vm1 = vcmask 7168  }
  0x1d   :  { %354 = vmatprep.mubr.msk.bf16.mxu0 %vm453_vm0, %v452_v0  ;;  %374 = vmatprep.mubr.msk.bf16.mxu1 %vm453_vm0, %v452_v0  ;;  %v389_v6 = vld [vmem:[#allocation2 + $0x28] sm:$0xff]   ;;  %v390_v7 = vld [vmem:[#allocation4 + $0x20] sm:$0xff]   ;;  %v392_v9 = vld [vmem:[#allocation4 + $0x18] sm:$0xff]  }
  0x1e   :  { %339 = vmatpush3.bf16.msra.mxu0 %v384_v1  ;;  %359 = vmatpush3.bf16.msra.mxu1 %v385_v2  ;;  %v391_v8 = vld [vmem:[#allocation2 + $0x20] sm:$0xff]   ;;  %v393_v10 = vld [vmem:[#allocation2 + $0x18] sm:$0xff]   ;;  %v394_v11 = vld [vmem:[#allocation4 + $0x10] sm:$0xff]  }
  0x1f   :  { %340 = vmatprep.subr.bf16.mxu0 %v452_v0  ;;  %360 = vmatprep.subr.bf16.mxu1 %v452_v0  ;;  %v395_v12 = vld [vmem:[#allocation2 + $0x10] sm:$0xff]   ;;  %v396_v13 = vld [vmem:[#allocation4 + $0x8] sm:$0xff]   ;;  %v398_v15 = vld [vmem:[#allocation4] sm:$0xff]  }
  0x20   :  { %v397_v14 = vld [vmem:[#allocation2 + $0x8] sm:$0xff]   ;;  %v55_v16 = vld [vmem:[%s519_s1] sm:$0xff] }
  0x21   :  { %v399_v17 = vld [vmem:[#allocation2] sm:$0xff]   ;;  %v73_v19 = vpack.c.bf16 %v55_v16, %v55_v16 }
  0x22   :  { %341 = vmatpush3.bf16.msra.mxu0 %v386_v3  ;;  %361 = vmatpush3.bf16.msra.mxu1 %v387_v4  ;;  %v54_v18 = vld [vmem:[%s518_s0] sm:$0xff] }
  0x23   :  { %342 = vmatprep.subr.bf16.mxu0 %v452_v0  ;;  %362 = vmatprep.subr.bf16.mxu1 %v452_v0  ;;  %v56_v20 = vpack.c.bf16 %v54_v18, %v54_v18  ;;  %v318_v23 = vld [vmem:[%s522_s4] ss:$0 sm:$0xff] }
  0x24   :  { %v319_v32 = vld [vmem:[%s523_s5] ss:$0 sm:$0xff] }
  0x26   :  { %343 = vmatpush3.bf16.msra.mxu0 %v388_v5  ;;  %363 = vmatpush3.bf16.msra.mxu1 %v389_v6 }
  0x27   :  { %344 = vmatprep.subr.bf16.mxu0 %v452_v0  ;;  %364 = vmatprep.subr.bf16.mxu1 %v452_v0 }
  0x2a   :  { %345 = vmatpush3.bf16.msra.mxu0 %v390_v7  ;;  %365 = vmatpush3.bf16.msra.mxu1 %v391_v8 }
  0x2b   :  { %346 = vmatprep.subr.bf16.mxu0 %v452_v0  ;;  %366 = vmatprep.subr.bf16.mxu1 %v452_v0 }
  0x2e   :  { %347 = vmatpush3.bf16.msra.mxu0 %v392_v9  ;;  %367 = vmatpush3.bf16.msra.mxu1 %v393_v10 }
  0x2f   :  { %348 = vmatprep.subr.bf16.mxu0 %v452_v0  ;;  %368 = vmatprep.subr.bf16.mxu1 %v452_v0 }
  0x32   :  { %349 = vmatpush3.bf16.msra.mxu0 %v394_v11  ;;  %369 = vmatpush3.bf16.msra.mxu1 %v395_v12 }
  0x33   :  { %350 = vmatprep.subr.bf16.mxu0 %v452_v0  ;;  %370 = vmatprep.subr.bf16.mxu1 %v452_v0 }
  0x36   :  { %351 = vmatpush3.bf16.msra.mxu0 %v396_v13  ;;  %371 = vmatpush3.bf16.msra.mxu1 %v397_v14 }
  0x37   :  { %352 = vmatprep.subr.bf16.mxu0 %v452_v0  ;;  %372 = vmatprep.subr.bf16.mxu1 %v452_v0 }
  0x3a   :  { %353 = vmatpush3.bf16.msra.mxu0 %v398_v15  ;;  %373 = vmatpush3.bf16.msra.mxu1 %v399_v17 }
  0x3d   :  { %355 = vmatmul.mubr.bf16.vlgmr.msra.gmra.mxu0 %v73_v19  ;;  %375 = vmatmul.mubr.bf16.vlgmr.msra.gmra.mxu1 %v56_v20 }
  0xfd   :  { %v172_v21 = vpop.f32.mrf.mxu0  ;;  %v260_v22 = vpop.f32.mrf.mxu1 }
  0xfe   :  { %v261_v24 = vadd.f32 %v260_v22, %v172_v21 }
  0xff   :  { %v356_v25 = vpop.f32.mrf.mxu0  ;;  %v376_v26 = vpop.f32.mrf.mxu1 }
 0x100   :  { %v273_v27 = vadd.f32 %v318_v23, %v261_v24 }
 0x101   :  { %v175_v28 = vpop.f32.mrf.mxu0  ;;  %v263_v29 = vpop.f32.mrf.mxu1 }
 0x102   :  { %400 = vtanh.f32 %v273_v27 }
 0x103   :  { %v357_v30 = vpop.f32.mrf.mxu0  ;;  %v377_v31 = vpop.f32.mrf.mxu1 }
 0x10f   :  { %v401_v33 = vpop.eup %400 }
 0x110   :  { %v282_v34 = vmul.f32 %v401_v33, %v319_v32 }
 0x112   :  { %283 = vadd.xlane.f32.xlu0 %v282_v34 }
 0x19b   :  { %v284_v35 = vpop.xlane.xlu0 %283 }
 0x19c   :  { %v285_v36 = vsub.f32 %v284_v35, %v284_v35 }
 0x19e   :  { %v286_v37 = vmul.f32 1.442695, %v285_v36 }
 0x1a0   :  { %402 = vpow2.f32 %v286_v37 }
 0x1ad   :  { %v403_v38 = vpop.eup %402 }
 0x1ae   :  { %289 = vst.msk [vmem:[%s525_s7] sm:$0xff] %vm288_vm1, %v403_v38  ;;  %v290_v39 = vmul.f32 %v403_v38, %v55_v16 }
 0x1b0   :  { %291 = vst [vmem:[%s524_s6] sm:$0xff] %v290_v39 }
 0x1b1   :  { %300 = vsyncpa [#allocation3], 1 }
 0x1b2   :  { %301 = vsyncpa [#allocation5], 1 }

</bundles_post_ra>
